<compile_context>
chip_gen: v7x
topology: tpu7x:2x2x1
jax: 0.10.0
libtpu: 0.0.40
codegen_flags: <defaults>
</compile_context>

<pallas_src>
import functools

import jax
import jax.numpy as jnp
from jax.experimental import pallas as pl
from jax.experimental.pallas import tpu as pltpu


def _vmem_limit_bytes():
    """VMEM limit with headroom: ~48 MiB on v7x (64 MiB/TC), 96 MiB on v5e/v6e (128 MiB)."""
    try:
        cap = pltpu.get_tpu_info().vmem_capacity_bytes
    except Exception:
        cap = 64 * 1024 * 1024  # conservative fallback (v7x per-TensorCore VMEM)
    return int(min(96 * 1024 * 1024, (cap * 3) // 4))


# ---------------------------------------------------------------------------
# Fused single-pass kernel: pool -> gate -> scale, one batch tile per grid step.
# ---------------------------------------------------------------------------
def _se_fused_kernel(x_ref, w1t_ref, w2t_ref, o_ref):
    # x_ref/o_ref: (Bt, C, L); w1t_ref: (C, Cr); w2t_ref: (Cr, C)  (pre-transposed)
    l = x_ref.shape[-1]
    # Squeeze: average pool over L with f32 accumulation (no full f32 block copy).
    pooled = jnp.sum(x_ref[...], axis=-1, dtype=jnp.float32) * (1.0 / l)       # (Bt, C)
    # Excite: weights pre-transposed in the wrapper -> straight MXU matmuls.
    h = jnp.maximum(jnp.dot(pooled, w1t_ref[...],
                            preferred_element_type=jnp.float32), 0.0)          # (Bt, Cr)
    s = jnp.dot(h, w2t_ref[...], preferred_element_type=jnp.float32)           # (Bt, C)
    y = jax.nn.sigmoid(s)
    # Scale: broadcast the per-(b, c) gate along L (lane axis).
    o_ref[...] = x_ref[...] * y.astype(o_ref.dtype)[:, :, None]


def _se_fused(x, w1_t, w2_t, block_budget, vmem_limit):
    B, C, L = x.shape
    Cr = w1_t.shape[1]
    itemsize = x.dtype.itemsize

    bt = max(1, min(B, block_budget // max(1, C * L * itemsize)))
    # Keep >= 2 grid blocks so "parallel" can shard the batch axis across the two
    # TensorCores on v7x (grid=(1,) would idle one core on an HBM-bound kernel).
    bt = min(bt, max(1, B // 2))
    grid = (pl.cdiv(B, bt),)  # ragged last block OK: leading axis, masked writeback

    cost = pl.CostEstimate(
        flops=int(2 * B * C * Cr * 2 + 2 * B * C * L),
        transcendentals=int(B * C),
        bytes_accessed=int(2 * B * C * L * itemsize
                           + (w1_t.size + w2_t.size) * w1_t.dtype.itemsize),
    )
    return pl.pallas_call(
        _se_fused_kernel,
        out_shape=jax.ShapeDtypeStruct((B, C, L), x.dtype),
        grid=grid,
        in_specs=[
            pl.BlockSpec((bt, C, L), lambda b: (b, 0, 0)),
            pl.BlockSpec(w1_t.shape, lambda b: (0, 0)),   # VMEM-resident
            pl.BlockSpec(w2_t.shape, lambda b: (0, 0)),   # VMEM-resident
        ],
        out_specs=pl.BlockSpec((bt, C, L), lambda b: (b, 0, 0)),
        compiler_params=pltpu.CompilerParams(
            dimension_semantics=("parallel",),
            vmem_limit_bytes=vmem_limit,
        ),
        cost_estimate=cost,
    )(x, w1_t, w2_t)


# ---------------------------------------------------------------------------
# Two-pass fallback for samples whose (C, L) slab exceeds the block budget:
#   pass 1: L-tiled pool (f32 accumulator) + gate  -> y: (B, C, 1)
#   pass 2: (batch, L)-gridded scale                -> x * y
# ---------------------------------------------------------------------------
def _se_gate_kernel(x_ref, w1t_ref, w2t_ref, y_ref, acc_ref, *, full_l):
    li = pl.program_id(1)
    l_tile = x_ref.shape[-1]

    @pl.when(li == 0)
    def _():
        acc_ref[...] = jnp.zeros_like(acc_ref)

    x_blk = x_ref[...]
    if full_l % l_tile != 0:
        # Mask the padded tail of the last L chunk out of the running sum.
        col = jax.lax.broadcasted_iota(jnp.int32, x_blk.shape, 2)
        x_blk = jnp.where(col + li * l_tile < full_l, x_blk, jnp.zeros_like(x_blk))
    acc_ref[...] += jnp.sum(x_blk, axis=-1, dtype=jnp.float32)

    @pl.when(li == pl.num_programs(1) - 1)
    def _():
        pooled = acc_ref[...] * (1.0 / full_l)                                 # (Bt, C)
        h = jnp.maximum(jnp.dot(pooled, w1t_ref[...],
                                preferred_element_type=jnp.float32), 0.0)
        s = jnp.dot(h, w2t_ref[...], preferred_element_type=jnp.float32)
        y_ref[...] = jax.nn.sigmoid(s).astype(y_ref.dtype)[:, :, None]


def _se_scale_kernel(x_ref, y_ref, o_ref):
    # (Bt, C, Lt) * (Bt, C, 1) -> broadcast the gate along L.
    o_ref[...] = x_ref[...] * y_ref[...].astype(o_ref.dtype)


def _se_two_pass(x, w1_t, w2_t, block_budget, vmem_limit):
    B, C, L = x.shape
    itemsize = x.dtype.itemsize

    # L tile must be a multiple of 128 when it is not the full L.
    l_tile = (max(1, block_budget // (C * itemsize)) // 128) * 128
    l_tile = max(l_tile, 128)
    if l_tile >= L:
        l_tile = L
    # TODO(synk): for extreme C (C*128*itemsize > budget) additionally tile C in the
    # scale pass; the gate pass needs full C resident for the channel matmuls.

    bt = max(1, min(B, block_budget // max(1, C * l_tile * itemsize)))
    bt = min(bt, max(1, B // 2))
    nb = pl.cdiv(B, bt)
    nl = pl.cdiv(L, l_tile)

    # Pass 1: pool + gate -> y: (B, C, 1) float32.
    y = pl.pallas_call(
        functools.partial(_se_gate_kernel, full_l=L),
        out_shape=jax.ShapeDtypeStruct((B, C, 1), jnp.float32),
        grid=(nb, nl),
        in_specs=[
            pl.BlockSpec((bt, C, l_tile), lambda b, l: (b, 0, l)),
            pl.BlockSpec(w1_t.shape, lambda b, l: (0, 0)),
            pl.BlockSpec(w2_t.shape, lambda b, l: (0, 0)),
        ],
        out_specs=pl.BlockSpec((bt, C, 1), lambda b, l: (b, 0, 0)),
        scratch_shapes=[pltpu.VMEM((bt, C), jnp.float32)],
        compiler_params=pltpu.CompilerParams(
            dimension_semantics=("parallel", "arbitrary"),
            vmem_limit_bytes=vmem_limit,
        ),
    )(x, w1_t, w2_t)

    # Pass 2: scale x by the gate, gridded over (batch, L) tiles.
    return pl.pallas_call(
        _se_scale_kernel,
        out_shape=jax.ShapeDtypeStruct((B, C, L), x.dtype),
        grid=(nb, nl),
        in_specs=[
            pl.BlockSpec((bt, C, l_tile), lambda b, l: (b, 0, l)),
            pl.BlockSpec((bt, C, 1), lambda b, l: (b, 0, 0)),
        ],
        out_specs=pl.BlockSpec((bt, C, l_tile), lambda b, l: (b, 0, l)),
        compiler_params=pltpu.CompilerParams(
            dimension_semantics=("parallel", "parallel"),
            vmem_limit_bytes=vmem_limit,
        ),
    )(x, y)


# ---------------------------------------------------------------------------
# Public wrapper.
# ---------------------------------------------------------------------------
def se_layer(x, w1, w2, *, block_budget_bytes=None):
    """x: (B, C, L); w1: (C//r, C); w2: (C, C//r)  (PyTorch nn.Linear layout)."""
    B, C, L = x.shape
    itemsize = x.dtype.itemsize

    # One-time transpose in the wrapper so the kernel never re-transposes weights.
    w1_t = jnp.asarray(w1).T   # (C, Cr)
    w2_t = jnp.asarray(w2).T   # (Cr, C)

    vmem_limit = _vmem_limit_bytes()
    weight_bytes = (w1_t.size + w2_t.size) * w1_t.dtype.itemsize
    if block_budget_bytes is None:
        # 2 input + 2 output double-buffers per block (~4x block bytes), plus
        # (double-buffered) resident weights, plus ~20% headroom.
        block_budget_bytes = max(512 * 1024, (vmem_limit - 2 * weight_bytes) // 5)

    per_sample_bytes = C * L * itemsize
    if per_sample_bytes <= block_budget_bytes:
        return _se_fused(x, w1_t, w2_t, block_budget_bytes, vmem_limit)
    return _se_two_pass(x, w1_t, w2_t, block_budget_bytes, vmem_limit)


def se_layer_ref(x, w1, w2):
    """Pure-JAX reference mirroring the PyTorch forward."""
    pooled = jnp.mean(x.astype(jnp.float32), axis=-1)
    h = jnp.maximum(pooled @ w1.T, 0.0)
    y = jax.nn.sigmoid(h @ w2.T)
    return (x.astype(jnp.float32) * y[:, :, None]).astype(x.dtype)


if __name__ == "__main__":
    key = jax.random.PRNGKey(0)
    kx, k1, k2, kx2 = jax.random.split(key, 4)

    B, C, reduction = 2, 64, 16
    Cr = C // reduction

    # PyTorch Linear weight layout: (out_features, in_features).
    w1 = jax.random.normal(k1, (Cr, C), dtype=jnp.float32) * 0.1
    w2 = jax.random.normal(k2, (C, Cr), dtype=jnp.float32) * 0.1

    # --- fused single-pass path ---
    L = 32
    x = jax.random.normal(kx, (B, C, L), dtype=jnp.float32)
    out = jax.block_until_ready(se_layer(x, w1, w2))
    ref = se_layer_ref(x, w1, w2)
    assert out.shape == (B, C, L)
    assert jnp.allclose(out, ref, atol=1e-5, rtol=1e-5)

    # --- L-tiled two-pass fallback, forced with a tiny per-block budget (also
    #     exercises the ragged-L masking path: 320 % 128 != 0) ---
    L2 = 320
    x2 = jax.random.normal(kx2, (B, C, L2), dtype=jnp.float32)
    out2 = jax.block_until_ready(se_layer(x2, w1, w2, block_budget_bytes=48 * 1024))
    ref2 = se_layer_ref(x2, w1, w2)
    assert out2.shape == (B, C, L2)
    assert jnp.allclose(out2, ref2, atol=1e-5, rtol=1e-5)

    print("KERNEL_OK")
</pallas_src>

<mosaic_0001>
module attributes {stable_mosaic.version = 11 : i64} {
  func.func @_se_fused_kernel(%arg0: i32, %arg1: memref<1x64x32xf32, #tpu.memory_space<vmem>>, %arg2: memref<64x4xf32, #tpu.memory_space<vmem>>, %arg3: memref<4x64xf32, #tpu.memory_space<vmem>>, %arg4: memref<1x64x32xf32, #tpu.memory_space<vmem>>) attributes {dimension_semantics = [#tpu.dimension_semantics<parallel>], iteration_bounds = array<i64: 2>, scalar_prefetch = 0 : i64, scratch_operands = 0 : i64, tpu.core_type = #tpu.core_type<tc>, window_params = [{transform_indices = @transform_0, window_bounds = array<i64: 1, 64, 32>}, {pipeline_mode = #tpu.pipeline_mode<synchronous>, transform_indices = @transform_1, window_bounds = array<i64: 64, 4>}, {pipeline_mode = #tpu.pipeline_mode<synchronous>, transform_indices = @transform_2, window_bounds = array<i64: 4, 64>}, {transform_indices = @transform_3, window_bounds = array<i64: 1, 64, 32>}]} {
    %c0 = arith.constant 0 : index
    %c0_0 = arith.constant 0 : index
    %c0_1 = arith.constant 0 : index
    %0 = vector.load %arg1[%c0, %c0_0, %c0_1] : memref<1x64x32xf32, #tpu.memory_space<vmem>>, vector<1x64x32xf32>
    %cst = arith.constant dense<0.000000e+00> : vector<1x64xf32>
    %1 = vector.multi_reduction <add>, %0, %cst [2] : vector<1x64x32xf32> to vector<1x64xf32>
    %cst_2 = arith.constant 3.125000e-02 : f32
    %2 = vector.broadcast %cst_2 : f32 to vector<1x64xf32>
    %3 = arith.mulf %1, %2 : vector<1x64xf32>
    %c0_3 = arith.constant 0 : index
    %c0_4 = arith.constant 0 : index
    %4 = vector.load %arg2[%c0_3, %c0_4] : memref<64x4xf32, #tpu.memory_space<vmem>>, vector<64x4xf32>
    %cst_5 = arith.constant dense<0.000000e+00> : vector<1x4xf32>
    %5 = tpu.matmul %3, %4, %cst_5 {dimension_numbers = #tpu.dot_dimension_numbers<[1], [0], [0], [1], [0, 0, 1, 1], [], []>} : vector<1x64xf32>, vector<64x4xf32>, vector<1x4xf32> -> vector<1x4xf32>
    %cst_6 = arith.constant 0.000000e+00 : f32
    %6 = vector.broadcast %cst_6 : f32 to vector<1x4xf32>
    %7 = arith.maximumf %5, %6 : vector<1x4xf32>
    %c0_7 = arith.constant 0 : index
    %c0_8 = arith.constant 0 : index
    %8 = vector.load %arg3[%c0_7, %c0_8] : memref<4x64xf32, #tpu.memory_space<vmem>>, vector<4x64xf32>
    %cst_9 = arith.constant dense<0.000000e+00> : vector<1x64xf32>
    %9 = tpu.matmul %7, %8, %cst_9 {dimension_numbers = #tpu.dot_dimension_numbers<[1], [0], [0], [1], [0, 0, 1, 1], [], []>} : vector<1x4xf32>, vector<4x64xf32>, vector<1x64xf32> -> vector<1x64xf32>
    %10 = arith.negf %9 : vector<1x64xf32>
    %11 = math.exp %10 : vector<1x64xf32>
    %cst_10 = arith.constant 1.000000e+00 : f32
    %12 = vector.broadcast %cst_10 : f32 to vector<1x64xf32>
    %13 = arith.addf %12, %11 : vector<1x64xf32>
    %14 = arith.divf %12, %13 : vector<1x64xf32>
    %c0_11 = arith.constant 0 : index
    %c0_12 = arith.constant 0 : index
    %c0_13 = arith.constant 0 : index
    %15 = vector.load %arg1[%c0_11, %c0_12, %c0_13] : memref<1x64x32xf32, #tpu.memory_space<vmem>>, vector<1x64x32xf32>
    %16 = vector.shape_cast %14 : vector<1x64xf32> to vector<1x64x1xf32>
    %17 = vector.broadcast %16 : vector<1x64x1xf32> to vector<1x64x32xf32>
    %18 = arith.mulf %15, %17 : vector<1x64x32xf32>
    %c0_14 = arith.constant 0 : index
    %c0_15 = arith.constant 0 : index
    %c0_16 = arith.constant 0 : index
    %19 = vector.load %arg4[%c0_14, %c0_15, %c0_16] : memref<1x64x32xf32, #tpu.memory_space<vmem>>, vector<1x64x32xf32>
    tpu.vector_store %arg4[%c0_14, %c0_15, %c0_16], %18 {strides = array<i32>} : memref<1x64x32xf32, #tpu.memory_space<vmem>>, vector<1x64x32xf32>,
    return
  }
  func.func @transform_0(%arg0: i32) -> (i32, i32, i32) {
    %c0_i32 = arith.constant 0 : i32
    %c0_i32_0 = arith.constant 0 : i32
    %c0_i32_1 = arith.constant 0 : i32
    return %arg0, %c0_i32, %c0_i32_0 : i32, i32, i32
  }
  func.func @transform_1(%arg0: i32) -> (i32, i32) {
    %c0_i32 = arith.constant 0 : i32
    %c0_i32_0 = arith.constant 0 : i32
    %c0_i32_1 = arith.constant 0 : i32
    return %c0_i32, %c0_i32_0 : i32, i32
  }
  func.func @transform_2(%arg0: i32) -> (i32, i32) {
    %c0_i32 = arith.constant 0 : i32
    %c0_i32_0 = arith.constant 0 : i32
    %c0_i32_1 = arith.constant 0 : i32
    return %c0_i32, %c0_i32_0 : i32, i32
  }
  func.func @transform_3(%arg0: i32) -> (i32, i32, i32) {
    %c0_i32 = arith.constant 0 : i32
    %c0_i32_0 = arith.constant 0 : i32
    %c0_i32_1 = arith.constant 0 : i32
    return %arg0, %c0_i32, %c0_i32_0 : i32, i32, i32
  }
}

</mosaic_0001>

<bundles_post_ra>
// kernel: tpu_custom_call.1
= control target key start
LH: loop header
LB: loop body
LE: loop exit
PB: predicated region body
PF: predicated region fallthrough
CT: control target
= control target key end

     0   :  { %s658_s12 = smov 0   ;;  %s768_s0 = inlined_call_operand.vmem [shape: f32[2,64,32], index: 0, kind: input, shape index: {}]   ;;  %s769_s1 = inlined_call_operand.vmem [shape: f32[64,4], index: 1, kind: input, shape index: {}]   ;;  %s770_s2 = inlined_call_operand.vmem [shape: f32[4,64], index: 2, kind: input, shape index: {}]   ;;  %s771_s3 = inlined_call_operand.vmem [shape: f32[2,64,32], index: 3, kind: output, shape index: {}]  }
   0x1 LB: > { %s548_s13 = sadd.s32 4294967295, %s633_s12   ;;  %p552_p0 = scmp.ge.s32.totalorder %s633_s12, 1  ;;  %s633_s12 = sphi %s658_s12, %s13_s12  }
   0x2   : > { %p137_p1 = scmp.lt.s32.totalorder %s633_s12, 3 }
   0x4   : > { %p138_p2 = pnand %p552_p0, %p137_p1 }
   0x5   : > { %p161_p3 = scmp.lt.s32.totalorder (!%p138_p2), %s548_s13, 1  ;;  %vm179_vm0 = vcmask (!%p138_p2), 261120   ;;  %v212_v16 = vld [vmem:[%s769_s1] sm:$0xff] (!%p138_p2)  ;;  %v213_v17 = vld [vmem:[%s769_s1 + $0x8] sm:$0xff] (!%p138_p2)  ;;  %v635_v19 = vmov (!%p138_p2), 0.0|0.0   ;;  %v214_v20 = vld [vmem:[%s769_s1 + $0x10] sm:$0xff] (!%p138_p2)  ;;  %v228_v30 = vlaneseq (!%p138_p2) }
   0x6   : > { %141 = sbr.rel (%p138_p2) target bundleno = 766 (0x2fe), region = 32  ;;  %v601_v18 = vpack.c.bf16 (!%p138_p2), %v213_v17, %v212_v16  ;;  %600 = vmatprep.subr.bf16.mxu0 (!%p138_p2), %v635_v19  ;;  %v215_v21 = vld [vmem:[%s769_s1 + $0x18] sm:$0xff] (!%p138_p2)  ;;  %v216_v23 = vld [vmem:[%s769_s1 + $0x20] sm:$0xff] (!%p138_p2)  ;;  %v217_v24 = vld [vmem:[%s769_s1 + $0x28] sm:$0xff] (!%p138_p2)  ;;  %vm636_vm1 = vmmov (!%p138_p2), 0   ;;  %v637_v29 = vmov (!%p138_p2), 0.0  }
   0x7   : > { %v604_v22 = vpack.c.bf16 (!%p138_p2), %v215_v21, %v214_v20  ;;  %v607_v25 = vpack.c.bf16 (!%p138_p2), %v217_v24, %v216_v23  ;;  %v218_v26 = vld [vmem:[%s769_s1 + $0x30] sm:$0xff] (!%p138_p2)  ;;  %v219_v27 = vld [vmem:[%s769_s1 + $0x38] sm:$0xff] (!%p138_p2)  ;;  %592 = vmatprep.mubr.msk.f32.mxu0 (!%p138_p2), %vm636_vm1, %v637_v29  ;;  %595 = vmatprep.subr.mxu1 (!%p138_p2), %v637_v29  ;;  %v229_v31 = vand.u32 (!%p138_p2), 127, %v228_v30  ;;  %v730_v32 = vshrl.u32 (!%p138_p2), %v228_v30, 7  ;;  %v357_v23 = vld [vmem:[%s770_s2] sm:$0xf] (!%p138_p2) }
   0x8   : > { %602 = vmatpush3.bf16.msra.mxu0 (!%p138_p2), %v601_v18  ;;  %v610_v28 = vpack.c.bf16 (!%p138_p2), %v219_v27, %v218_v26  ;;  %597 = vmatprep.mubr.msk.f32.mxu1 (!%p138_p2), %vm636_vm1, %v637_v29  ;;  %vm239_vm2 = vcmask (!%p138_p2), 130112   ;;  %vm246_vm3 = vcmask (!%p138_p2), 195712   ;;  %vm253_vm4 = vcmask (!%p138_p2), 261312  }
   0x9   : > { %603 = vmatprep.subr.bf16.mxu0 (!%p138_p2), %v635_v19  ;;  %v234_v33 = vadd.s32 (!%p138_p2), 4294967288, %v229_v31  ;;  %v248_v34 = vadd.s32 (!%p138_p2), 4294967272, %v229_v31  ;;  %v241_v36 = vadd.s32 (!%p138_p2), 4294967280, %v229_v31  ;;  %v255_v38 = vadd.s32 (!%p138_p2), 4294967264, %v229_v31 }
   0xa   : > { %v232_v39 = vsub.s32 (!%p138_p2), %v229_v31, %v730_v32  ;;  %v262_v47 = vadd.s32 (!%p138_p2), 4294967256, %v229_v31  ;;  %v269_v51 = vadd.s32 (!%p138_p2), 4294967248, %v229_v31  ;;  %v276_v55 = vadd.s32 (!%p138_p2), 4294967240, %v229_v31 }
   0xb   : > { %v237_v41 = vsub.s32 (!%p138_p2), %v234_v33, %v730_v32  ;;  %v251_v42 = vsub.s32 (!%p138_p2), %v248_v34, %v730_v32  ;;  %v244_v43 = vsub.s32 (!%p138_p2), %v241_v36, %v730_v32  ;;  %v258_v50 = vsub.s32 (!%p138_p2), %v255_v38, %v730_v32 }
   0xc   : > { %605 = vmatpush3.bf16.msra.mxu0 (!%p138_p2), %v604_v22  ;;  %v265_v58 = vsub.s32 (!%p138_p2), %v262_v47, %v730_v32  ;;  %vm260_vm5 = vcmask (!%p138_p2), 326912   ;;  %vm267_vm6 = vcmask (!%p138_p2), 392512   ;;  %vm274_vm7 = vcmask (!%p138_p2), 458112  }
   0xd   : > { %s773_s13 = smov (!%p161_p3, %s548_s13), 1  ;;  %606 = vmatprep.subr.bf16.mxu0 %v635_v19  ;;  %vm281_vm8 = vcmask 523712   ;;  %vm283_vm9 = vcmask 523264   ;;  %vm362_vm10 = vcmask 1043456   ;;  %vm358_vm11 = vcmask 31744  }
   0xe   : > { %s563_s14 = sshll.u32 %s773_s13, 6  ;;  %596 = vmatpush3.msk.msra.mxu1 %vm362_vm10, %v357_v23  ;;  %v444_v33 = vsub.s32 0, %v730_v32 }
   0xf   : > { %s165_s17 = scalar_lea.vmem %s768_s0, %s563_s14  ;;  %s170_s11 = scalar_lea.vmem %s771_s3, %s563_s14 }
  0x10   : > { %v674_v0 = vld [vmem:[%s165_s17] sm:$0xff]  ;;  %v676_v1 = vld [vmem:[%s165_s17 + $0x10] sm:$0xff]  ;;  %v678_v2 = vld [vmem:[%s165_s17 + $0x8] sm:$0xff]  ;;  %608 = vmatpush3.bf16.msra.mxu0 %v607_v25 }
  0x11   : > { %v180_v3 = vsel %vm179_vm0, %v674_v0, 0.0  ;;  %v186_v4 = vsel %vm179_vm0, %v676_v1, 0.0  ;;  %v684_v5 = vld [vmem:[%s165_s17 + $0x18] sm:$0xff]  ;;  %v183_v6 = vsel %vm179_vm0, %v678_v2, 0.0  ;;  %v690_v8 = vld [vmem:[%s165_s17 + $0x20] sm:$0xff]  ;;  %v692_v9 = vld [vmem:[%s165_s17 + $0x28] sm:$0xff]  ;;  %609 = vmatprep.subr.bf16.mxu0 %v635_v19 }
  0x12   : > { %181 = vadd.xlane.f32.xlu0 %v180_v3  ;;  %187 = vadd.xlane.f32.xlu1 %v186_v4  ;;  %v189_v7 = vsel %vm179_vm0, %v684_v5, 0.0  ;;  %v192_v10 = vsel %vm179_vm0, %v690_v8, 0.0  ;;  %v195_v11 = vsel %vm179_vm0, %v692_v9, 0.0  ;;  %v698_v12 = vld [vmem:[%s165_s17 + $0x30] sm:$0xff]  ;;  %v700_v13 = vld [vmem:[%s165_s17 + $0x38] sm:$0xff] }
  0x13   : > { %v198_v14 = vsel %vm179_vm0, %v698_v12, 0.0  ;;  %v201_v15 = vsel %vm179_vm0, %v700_v13, 0.0 }
  0x14   : > { %611 = vmatpush3.bf16.msra.mxu0 %v610_v28 }
  0x16   : > { %184 = vadd.xlane.f32.xlu0 %v183_v6  ;;  %190 = vadd.xlane.f32.xlu1 %v189_v7  ;;  %v272_v6 = vsub.s32 %v269_v51, %v730_v32  ;;  %v279_v7 = vsub.s32 %v276_v55, %v730_v32 }
  0x1a   : > { %193 = vadd.xlane.f32.xlu0 %v192_v10  ;;  %196 = vadd.xlane.f32.xlu1 %v195_v11 }
  0x1e   : > { %199 = vadd.xlane.f32.xlu0 %v198_v14  ;;  %202 = vadd.xlane.f32.xlu1 %v201_v15 }
  0x9f   : > { %v182_v35 = vpop.xlane.xlu0 %181  ;;  %v188_v37 = vpop.xlane.xlu1 %187 }
  0xa0   : > { %v204_v40 = vmul.f32 0.03125, %v182_v35  ;;  %v206_v44 = vmul.f32 0.03125, %v188_v37 }
  0xa2   : > { %v233_v52 = vrot.slane %v204_v40, %v232_v39  ;;  %v245_v56 = vrot.slane %v206_v44, %v244_v43 }
  0xa3   : > { %v185_v45 = vpop.xlane.xlu0 %184  ;;  %v191_v46 = vpop.xlane.xlu1 %190 }
  0xa4   : > { %v205_v48 = vmul.f32 0.03125, %v185_v45  ;;  %v207_v49 = vmul.f32 0.03125, %v191_v46 }
  0xa6   : > { %v238_v53 = vrot.slane %v205_v48, %v237_v41  ;;  %v252_v54 = vrot.slane %v207_v49, %v251_v42 }
  0xa7   : > { %v194_v57 = vpop.xlane.xlu0 %193  ;;  %v197_v59 = vpop.xlane.xlu1 %196 }
  0xa8   : > { %v240_v60 = vsel %vm239_vm2, %v238_v53, %v233_v52  ;;  %v208_v61 = vmul.f32 0.03125, %v194_v57  ;;  %v209_v62 = vmul.f32 0.03125, %v197_v59 }
  0xa9   : > { %v247_v63 = vsel %vm246_vm3, %v245_v56, %v240_v60 }
  0xaa   : > { %v254_v3 = vsel %vm253_vm4, %v252_v54, %v247_v63  ;;  %v259_v4 = vrot.slane %v208_v61, %v258_v50  ;;  %v266_v10 = vrot.slane %v209_v62, %v265_v58 }
  0xab   : > { %v200_v11 = vpop.xlane.xlu0 %199  ;;  %v203_v14 = vpop.xlane.xlu1 %202 }
  0xac   : > { %v261_v15 = vsel %vm260_vm5, %v259_v4, %v254_v3  ;;  %v210_v16 = vmul.f32 0.03125, %v200_v11  ;;  %v211_v17 = vmul.f32 0.03125, %v203_v14 }
  0xad   : > { %v268_v20 = vsel %vm267_vm6, %v266_v10, %v261_v15 }
  0xae   : > { %v273_v18 = vrot.slane %v210_v16, %v272_v6  ;;  %v280_v19 = vrot.slane %v211_v17, %v279_v7 }
  0xb0   : > { %v275_v21 = vsel %vm274_vm7, %v273_v18, %v268_v20 }
  0xb1   : > { %v282_v22 = vsel %vm281_vm8, %v280_v19, %v275_v21 }
  0xb2   : > { %593 = vmatmul.mubr.msk.f32.vlgmr.msra.gmra.mrb[0].mxu0 %vm283_vm9, %v282_v22 }
 0x185   : > { %v352_v24 = vpop.f32.mrb[0].mxu0 }
 0x186   : > { %v356_v25 = vmax.f32 %v352_v24, 0.0  ;;  %v594_v26 = vpop.f32.mrb[1].mxu0 }
 0x188   : > { %598 = vmatmul.mubr.msk.f32.vlgmr.msra.gmra.mrb[0].mxu1 %vm358_vm11, %v356_v25 }
 0x25b   : > { %v432_v27 = vpop.f32.mrb[0].mxu1 }
 0x25c   : > { %v560_v28 = vmul.f32 -1.442695, %v432_v27  ;;  %v599_v29 = vpop.f32.mrb[1].mxu1 }
 0x25e   : > { %623 = vpow2.f32 %v560_v28 }
 0x268   : > { %v624_v30 = vpop.eup %623 }
 0x269   : > { %v439_v31 = vadd.f32 1.0, %v624_v30 }
 0x26b   : > { %625 = vrcp.f32 %v439_v31 }
 0x275   : > { %v626_v34 = vpop.eup %625 }
 0x276   : > { %v445_v35 = vrot.slane %v626_v34, %v444_v33 }
 0x278   : > { %451 = vbcast.lane.b32.xlu1 %v445_v35, 264  ;;  %447 = vbcast.lane.b32.xlu0 %v445_v35, 256 }
 0x27c   : > { %455 = vbcast.lane.b32.xlu1 %v445_v35, 272  ;;  %463 = vbcast.lane.b32.xlu0 %v445_v35, 288 }
 0x280   : > { %459 = vbcast.lane.b32.xlu1 %v445_v35, 280  ;;  %471 = vbcast.lane.b32.xlu0 %v445_v35, 304 }
 0x284   : > { %467 = vbcast.lane.b32.xlu1 %v445_v35, 296 }
 0x288   : > { %475 = vbcast.lane.b32.xlu1 %v445_v35, 312 }
 0x2ea   : > { %v452_v36 = vpop.permute.xlu1 %451  ;;  %v448_v37 = vpop.permute.xlu0 %447 }
 0x2eb   : > { %v478_v38 = vmul.f32 %v452_v36, %v678_v2  ;;  %v477_v32 = vmul.f32 %v448_v37, %v674_v0 }
 0x2ed   : > { %486 = vst.msk [vmem:[%s170_s11 + $0x8] sm:$0xff] %vm179_vm0, %v478_v38  ;;  %485 = vst.msk [vmem:[%s170_s11] sm:$0xff] %vm179_vm0, %v477_v32 }
 0x2ee   : > { %v456_v39 = vpop.permute.xlu1 %455  ;;  %v464_v40 = vpop.permute.xlu0 %463 }
 0x2ef   : > { %v479_v41 = vmul.f32 %v456_v39, %v676_v1  ;;  %v481_v42 = vmul.f32 %v464_v40, %v690_v8 }
 0x2f1   : > { %487 = vst.msk [vmem:[%s170_s11 + $0x10] sm:$0xff] %vm179_vm0, %v479_v41  ;;  %489 = vst.msk [vmem:[%s170_s11 + $0x20] sm:$0xff] %vm179_vm0, %v481_v42 }
 0x2f2   : > { %v460_v43 = vpop.permute.xlu1 %459  ;;  %v472_v44 = vpop.permute.xlu0 %471 }
 0x2f3   : > { %v480_v2 = vmul.f32 %v460_v43, %v684_v5  ;;  %v483_v0 = vmul.f32 %v472_v44, %v698_v12 }
 0x2f5   : > { %488 = vst.msk [vmem:[%s170_s11 + $0x18] sm:$0xff] %vm179_vm0, %v480_v2  ;;  %491 = vst.msk [vmem:[%s170_s11 + $0x30] sm:$0xff] %vm179_vm0, %v483_v0 }
 0x2f6   : > { %v468_v45 = vpop.permute.xlu1 %467 }
 0x2f7   : > { %v482_v46 = vmul.f32 %v468_v45, %v692_v9 }
 0x2f9   : > { %490 = vst.msk [vmem:[%s170_s11 + $0x28] sm:$0xff] %vm179_vm0, %v482_v46 }
 0x2fa   : > { %v476_v1 = vpop.permute.xlu1 %475 }
 0x2fb   : > { %v484_v8 = vmul.f32 %v476_v1, %v700_v13 }
 0x2fd   : > { %492 = vst.msk [vmem:[%s170_s11 + $0x38] sm:$0xff] %vm179_vm0, %v484_v8 }
 0x2fe PF: > { %s13_s12 = sadd.s32 1, %s633_s12  }
 0x2ff   : > { %p10_p4 = scmp.ge.s32.totalorder %s13_s12, 4  }
 0x301   :  { %12 = sbr.rel (!%p10_p4) target bundleno = 1 (0x1), region = 62 }

</bundles_post_ra>
